<compile_context>
chip_gen: v5e
topology: v5e:2x2
jax: 0.10.0
libtpu: 0.0.40
codegen_flags: <defaults>
</compile_context>

<pallas_src>
import math

import jax
import jax.numpy as jnp
from jax.experimental import pallas as pl
from jax.experimental.pallas import tpu as pltpu  # noqa: F401  (TPU backend import, kept per convention)

EMB = 32
HEADS = 4
HEAD_DIM = EMB // HEADS
T = 8
B = 2


def mhca_kernel(x1_ref, x2_ref,
                wq_ref, bq_ref,      # (EMB, EMB), (1, EMB)      pre-transposed, scale folded in
                wkv_ref, bkv_ref,    # (EMB, 2*EMB), (1, 2*EMB)  fused K|V, pre-transposed
                wo_ref, bo_ref,      # (EMB, EMB), (1, EMB)      pre-transposed
                out_ref):            # (B*T, EMB)
    x1 = x1_ref[...]     # (B*T, EMB)
    x2 = x2_ref[...]     # (B*T, EMB)
    wo = wo_ref[...]     # (EMB, EMB), already (in, out)

    # Projections: y = x @ W  (weights already transposed to (in, out)).
    # The 1/sqrt(emb) attention scale is pre-folded into wq / bq.
    q = jnp.dot(x1, wq_ref[...], preferred_element_type=jnp.float32) + bq_ref[...]     # (B*T, EMB)
    kv = jnp.dot(x2, wkv_ref[...], preferred_element_type=jnp.float32) + bkv_ref[...]  # (B*T, 2*EMB)

    # Split batch back out (sublane-tile-aligned reshape; lane dim unchanged).
    qb = q.reshape(B, T, EMB)
    kb = kv[:, :EMB].reshape(B, T, EMB)
    vb = kv[:, EMB:].reshape(B, T, EMB)

    # Per-head attention, batched over the batch dim with einsums (no transposes).
    # The unify ("output") projection is accumulated per head instead of
    # concatenating head outputs: out = sum_h yh @ Wo_t[h*D:(h+1)*D, :] + bo.
    acc = jnp.zeros((B * T, EMB), jnp.float32)
    for h in range(HEADS):
        s0 = h * HEAD_DIM
        qh = qb[:, :, s0:s0 + HEAD_DIM]   # (B, T, D)
        kh = kb[:, :, s0:s0 + HEAD_DIM]   # (B, T, D)
        vh = vb[:, :, s0:s0 + HEAD_DIM]   # (B, T, D)

        scores = jnp.einsum("bqd,bkd->bqk", qh, kh,
                            preferred_element_type=jnp.float32)           # (B, T, T)
        m = jnp.max(scores, axis=-1, keepdims=True)
        w = jnp.exp(scores - m)
        w = w * pl.reciprocal(jnp.sum(w, axis=-1, keepdims=True), approx=True)
        yh = jnp.einsum("bqk,bkd->bqd", w, vh,
                        preferred_element_type=jnp.float32)               # (B, T, D)

        acc = acc + jnp.dot(yh.reshape(B * T, HEAD_DIM),
                            wo[s0:s0 + HEAD_DIM, :],
                            preferred_element_type=jnp.float32)

    out_ref[...] = acc + bo_ref[...]


def prepare_params(params):
    """One-time host-side parameter transform (done at load time, not per call)."""
    wq, bq, wk, bk, wv, bv, wo, bo = params
    scale = 1.0 / math.sqrt(float(EMB))  # PyTorch module scales by sqrt(emb), not sqrt(head_dim)
    wq_t = (wq * scale).T                            # (in, out), scale folded in
    bq_s = bq * scale                                # (1, EMB)
    wkv_t = jnp.concatenate([wk.T, wv.T], axis=1)    # (in, 2*EMB)
    bkv = jnp.concatenate([bk, bv], axis=1)          # (1, 2*EMB)
    wo_t = wo.T                                      # (in, out)
    return wq_t, bq_s, wkv_t, bkv, wo_t, bo


def multi_head_cross_attention(x1, x2, prepared):
    b, t, emb = x1.shape
    x1f = x1.reshape(b * t, emb)
    x2f = x2.reshape(b * t, emb)
    out = pl.pallas_call(
        mhca_kernel,
        out_shape=jax.ShapeDtypeStruct((b * t, emb), jnp.float32),
    )(x1f, x2f, *prepared)
    return out.reshape(b, t, emb)


def init_linear(key, in_f, out_f):
    # PyTorch nn.Linear default init: U(-1/sqrt(in), 1/sqrt(in)) for weight and bias.
    kw, kb = jax.random.split(key)
    bound = 1.0 / math.sqrt(in_f)
    w = jax.random.uniform(kw, (out_f, in_f), jnp.float32, -bound, bound)
    b = jax.random.uniform(kb, (1, out_f), jnp.float32, -bound, bound)
    return w, b


def reference(x1, x2, params):
    wq, bq, wk, bk, wv, bv, wo, bo = params
    b, t, emb = x1.shape
    h, hd = HEADS, HEAD_DIM
    q = x1 @ wq.T + bq
    k = x2 @ wk.T + bk
    v = x2 @ wv.T + bv
    q = q.reshape(b, t, h, hd).transpose(0, 2, 1, 3)
    k = k.reshape(b, t, h, hd).transpose(0, 2, 1, 3)
    v = v.reshape(b, t, h, hd).transpose(0, 2, 1, 3)
    w = jnp.einsum("bhqd,bhkd->bhqk", q, k) / math.sqrt(emb)
    w = jax.nn.softmax(w, axis=-1)
    y = jnp.einsum("bhqk,bhkd->bhqd", w, v)
    y = y.transpose(0, 2, 1, 3).reshape(b, t, emb)
    return y @ wo.T + bo


if __name__ == "__main__":
    key = jax.random.PRNGKey(0)
    k_x1, k_x2, k_q, k_k, k_v, k_o = jax.random.split(key, 6)

    x1 = jax.random.normal(k_x1, (B, T, EMB), jnp.float32)
    x2 = jax.random.normal(k_x2, (B, T, EMB), jnp.float32)

    wq, bq = init_linear(k_q, EMB, EMB)
    wk, bk = init_linear(k_k, EMB, EMB)
    wv, bv = init_linear(k_v, EMB, EMB)
    wo, bo = init_linear(k_o, EMB, EMB)
    params = (wq, bq, wk, bk, wv, bv, wo, bo)

    prepared = prepare_params(params)

    out = multi_head_cross_attention(x1, x2, prepared)
    out = jax.block_until_ready(out)

    ref = jax.block_until_ready(reference(x1, x2, params))
    assert out.shape == (B, T, EMB)
    # Tolerance loosened slightly vs 1e-4 because of pl.reciprocal(approx=True).
    assert jnp.allclose(out, ref, atol=2e-3, rtol=2e-3), "mismatch vs reference"

    print("KERNEL_OK")
</pallas_src>

<mosaic_0001>
module attributes {stable_mosaic.version = 11 : i64} {
  func.func @mhca_kernel(%arg0: memref<16x32xf32, #tpu.memory_space<vmem>>, %arg1: memref<16x32xf32, #tpu.memory_space<vmem>>, %arg2: memref<32x32xf32, #tpu.memory_space<vmem>>, %arg3: memref<1x32xf32, #tpu.memory_space<vmem>>, %arg4: memref<32x64xf32, #tpu.memory_space<vmem>>, %arg5: memref<1x64xf32, #tpu.memory_space<vmem>>, %arg6: memref<32x32xf32, #tpu.memory_space<vmem>>, %arg7: memref<1x32xf32, #tpu.memory_space<vmem>>, %arg8: memref<16x32xf32, #tpu.memory_space<vmem>>) attributes {dimension_semantics = [], scalar_prefetch = 0 : i64, scratch_operands = 0 : i64, tpu.core_type = #tpu.core_type<tc>} {
    %c0 = arith.constant 0 : index
    %c0_0 = arith.constant 0 : index
    %0 = vector.load %arg0[%c0, %c0_0] : memref<16x32xf32, #tpu.memory_space<vmem>>, vector<16x32xf32>
    %c0_1 = arith.constant 0 : index
    %c0_2 = arith.constant 0 : index
    %1 = vector.load %arg1[%c0_1, %c0_2] : memref<16x32xf32, #tpu.memory_space<vmem>>, vector<16x32xf32>
    %c0_3 = arith.constant 0 : index
    %c0_4 = arith.constant 0 : index
    %2 = vector.load %arg6[%c0_3, %c0_4] : memref<32x32xf32, #tpu.memory_space<vmem>>, vector<32x32xf32>
    %c0_5 = arith.constant 0 : index
    %c0_6 = arith.constant 0 : index
    %3 = vector.load %arg2[%c0_5, %c0_6] : memref<32x32xf32, #tpu.memory_space<vmem>>, vector<32x32xf32>
    %cst = arith.constant dense<0.000000e+00> : vector<16x32xf32>
    %4 = tpu.matmul %0, %3, %cst {dimension_numbers = #tpu.dot_dimension_numbers<[1], [0], [0], [1], [0, 0, 1, 1], [], []>} : vector<16x32xf32>, vector<32x32xf32>, vector<16x32xf32> -> vector<16x32xf32>
    %c0_7 = arith.constant 0 : index
    %c0_8 = arith.constant 0 : index
    %5 = vector.load %arg3[%c0_7, %c0_8] : memref<1x32xf32, #tpu.memory_space<vmem>>, vector<1x32xf32>
    %6 = vector.broadcast %5 : vector<1x32xf32> to vector<16x32xf32>
    %7 = arith.addf %4, %6 : vector<16x32xf32>
    %c0_9 = arith.constant 0 : index
    %c0_10 = arith.constant 0 : index
    %8 = vector.load %arg4[%c0_9, %c0_10] : memref<32x64xf32, #tpu.memory_space<vmem>>, vector<32x64xf32>
    %cst_11 = arith.constant dense<0.000000e+00> : vector<16x64xf32>
    %9 = tpu.matmul %1, %8, %cst_11 {dimension_numbers = #tpu.dot_dimension_numbers<[1], [0], [0], [1], [0, 0, 1, 1], [], []>} : vector<16x32xf32>, vector<32x64xf32>, vector<16x64xf32> -> vector<16x64xf32>
    %c0_12 = arith.constant 0 : index
    %c0_13 = arith.constant 0 : index
    %10 = vector.load %arg5[%c0_12, %c0_13] : memref<1x64xf32, #tpu.memory_space<vmem>>, vector<1x64xf32>
    %11 = vector.broadcast %10 : vector<1x64xf32> to vector<16x64xf32>
    %12 = arith.addf %9, %11 : vector<16x64xf32>
    %13 = vector.shape_cast %7 : vector<16x32xf32> to vector<2x8x32xf32>
    %14 = vector.extract_strided_slice %12 {offsets = [0, 0], sizes = [16, 32], strides = [1, 1]} : vector<16x64xf32> to vector<16x32xf32>
    %15 = vector.shape_cast %14 : vector<16x32xf32> to vector<2x8x32xf32>
    %16 = vector.extract_strided_slice %12 {offsets = [0, 32], sizes = [16, 32], strides = [1, 1]} : vector<16x64xf32> to vector<16x32xf32>
    %17 = vector.shape_cast %16 : vector<16x32xf32> to vector<2x8x32xf32>
    %cst_14 = arith.constant 0.000000e+00 : f32
    %18 = vector.broadcast %cst_14 : f32 to vector<16x32xf32>
    %19 = vector.extract_strided_slice %13 {offsets = [0, 0, 0], sizes = [2, 8, 8], strides = [1, 1, 1]} : vector<2x8x32xf32> to vector<2x8x8xf32>
    %20 = vector.extract_strided_slice %15 {offsets = [0, 0, 0], sizes = [2, 8, 8], strides = [1, 1, 1]} : vector<2x8x32xf32> to vector<2x8x8xf32>
    %21 = vector.extract_strided_slice %17 {offsets = [0, 0, 0], sizes = [2, 8, 8], strides = [1, 1, 1]} : vector<2x8x32xf32> to vector<2x8x8xf32>
    "tpu.trace_start"() <{level = 10 : i32, message = "bqd,bkd->bqk"}> : () -> ()
    %cst_15 = arith.constant dense<0.000000e+00> : vector<2x8x8xf32>
    %22 = tpu.matmul %19, %20, %cst_15 {dimension_numbers = #tpu.dot_dimension_numbers<[2], [2], [1], [1], [0, 0, 0, 1, 1, 1], [0], [0]>} : vector<2x8x8xf32>, vector<2x8x8xf32>, vector<2x8x8xf32> -> vector<2x8x8xf32>
    "tpu.trace_stop"() : () -> ()
    %cst_16 = arith.constant dense<0xFF800000> : vector<2x8xf32>
    %23 = vector.multi_reduction <maximumf>, %22, %cst_16 [2] : vector<2x8x8xf32> to vector<2x8xf32>
    %24 = vector.shape_cast %23 : vector<2x8xf32> to vector<2x8x1xf32>
    %25 = vector.broadcast %24 : vector<2x8x1xf32> to vector<2x8x8xf32>
    %26 = arith.subf %22, %25 : vector<2x8x8xf32>
    %27 = math.exp %26 : vector<2x8x8xf32>
    %cst_17 = arith.constant dense<0.000000e+00> : vector<2x8xf32>
    %28 = vector.multi_reduction <add>, %27, %cst_17 [2] : vector<2x8x8xf32> to vector<2x8xf32>
    %29 = vector.shape_cast %28 : vector<2x8xf32> to vector<2x8x1xf32>
    %30 = tpu.reciprocal %29 {approx = true} : vector<2x8x1xf32> -> vector<2x8x1xf32>
    %31 = vector.broadcast %30 : vector<2x8x1xf32> to vector<2x8x8xf32>
    %32 = arith.mulf %27, %31 : vector<2x8x8xf32>
    "tpu.trace_start"() <{level = 10 : i32, message = "bqk,bkd->bqd"}> : () -> ()
    %cst_18 = arith.constant dense<0.000000e+00> : vector<2x8x8xf32>
    %33 = tpu.matmul %32, %21, %cst_18 {dimension_numbers = #tpu.dot_dimension_numbers<[2], [1], [1], [2], [0, 0, 0, 1, 1, 2], [0], [0]>} : vector<2x8x8xf32>, vector<2x8x8xf32>, vector<2x8x8xf32> -> vector<2x8x8xf32>
    "tpu.trace_stop"() : () -> ()
    %34 = vector.shape_cast %33 : vector<2x8x8xf32> to vector<16x8xf32>
    %35 = vector.extract_strided_slice %2 {offsets = [0, 0], sizes = [8, 32], strides = [1, 1]} : vector<32x32xf32> to vector<8x32xf32>
    %cst_19 = arith.constant dense<0.000000e+00> : vector<16x32xf32>
    %36 = tpu.matmul %34, %35, %cst_19 {dimension_numbers = #tpu.dot_dimension_numbers<[1], [0], [0], [1], [0, 0, 1, 1], [], []>} : vector<16x8xf32>, vector<8x32xf32>, vector<16x32xf32> -> vector<16x32xf32>
    %37 = arith.addf %18, %36 : vector<16x32xf32>
    %38 = vector.extract_strided_slice %13 {offsets = [0, 0, 8], sizes = [2, 8, 8], strides = [1, 1, 1]} : vector<2x8x32xf32> to vector<2x8x8xf32>
    %39 = vector.extract_strided_slice %15 {offsets = [0, 0, 8], sizes = [2, 8, 8], strides = [1, 1, 1]} : vector<2x8x32xf32> to vector<2x8x8xf32>
    %40 = vector.extract_strided_slice %17 {offsets = [0, 0, 8], sizes = [2, 8, 8], strides = [1, 1, 1]} : vector<2x8x32xf32> to vector<2x8x8xf32>
    "tpu.trace_start"() <{level = 10 : i32, message = "bqd,bkd->bqk"}> : () -> ()
    %cst_20 = arith.constant dense<0.000000e+00> : vector<2x8x8xf32>
    %41 = tpu.matmul %38, %39, %cst_20 {dimension_numbers = #tpu.dot_dimension_numbers<[2], [2], [1], [1], [0, 0, 0, 1, 1, 1], [0], [0]>} : vector<2x8x8xf32>, vector<2x8x8xf32>, vector<2x8x8xf32> -> vector<2x8x8xf32>
    "tpu.trace_stop"() : () -> ()
    %cst_21 = arith.constant dense<0xFF800000> : vector<2x8xf32>
    %42 = vector.multi_reduction <maximumf>, %41, %cst_21 [2] : vector<2x8x8xf32> to vector<2x8xf32>
    %43 = vector.shape_cast %42 : vector<2x8xf32> to vector<2x8x1xf32>
    %44 = vector.broadcast %43 : vector<2x8x1xf32> to vector<2x8x8xf32>
    %45 = arith.subf %41, %44 : vector<2x8x8xf32>
    %46 = math.exp %45 : vector<2x8x8xf32>
    %cst_22 = arith.constant dense<0.000000e+00> : vector<2x8xf32>
    %47 = vector.multi_reduction <add>, %46, %cst_22 [2] : vector<2x8x8xf32> to vector<2x8xf32>
    %48 = vector.shape_cast %47 : vector<2x8xf32> to vector<2x8x1xf32>
    %49 = tpu.reciprocal %48 {approx = true} : vector<2x8x1xf32> -> vector<2x8x1xf32>
    %50 = vector.broadcast %49 : vector<2x8x1xf32> to vector<2x8x8xf32>
    %51 = arith.mulf %46, %50 : vector<2x8x8xf32>
    "tpu.trace_start"() <{level = 10 : i32, message = "bqk,bkd->bqd"}> : () -> ()
    %cst_23 = arith.constant dense<0.000000e+00> : vector<2x8x8xf32>
    %52 = tpu.matmul %51, %40, %cst_23 {dimension_numbers = #tpu.dot_dimension_numbers<[2], [1], [1], [2], [0, 0, 0, 1, 1, 2], [0], [0]>} : vector<2x8x8xf32>, vector<2x8x8xf32>, vector<2x8x8xf32> -> vector<2x8x8xf32>
    "tpu.trace_stop"() : () -> ()
    %53 = vector.shape_cast %52 : vector<2x8x8xf32> to vector<16x8xf32>
    %54 = vector.extract_strided_slice %2 {offsets = [8, 0], sizes = [8, 32], strides = [1, 1]} : vector<32x32xf32> to vector<8x32xf32>
    %cst_24 = arith.constant dense<0.000000e+00> : vector<16x32xf32>
    %55 = tpu.matmul %53, %54, %cst_24 {dimension_numbers = #tpu.dot_dimension_numbers<[1], [0], [0], [1], [0, 0, 1, 1], [], []>} : vector<16x8xf32>, vector<8x32xf32>, vector<16x32xf32> -> vector<16x32xf32>
    %56 = arith.addf %37, %55 : vector<16x32xf32>
    %57 = vector.extract_strided_slice %13 {offsets = [0, 0, 16], sizes = [2, 8, 8], strides = [1, 1, 1]} : vector<2x8x32xf32> to vector<2x8x8xf32>
    %58 = vector.extract_strided_slice %15 {offsets = [0, 0, 16], sizes = [2, 8, 8], strides = [1, 1, 1]} : vector<2x8x32xf32> to vector<2x8x8xf32>
    %59 = vector.extract_strided_slice %17 {offsets = [0, 0, 16], sizes = [2, 8, 8], strides = [1, 1, 1]} : vector<2x8x32xf32> to vector<2x8x8xf32>
    "tpu.trace_start"() <{level = 10 : i32, message = "bqd,bkd->bqk"}> : () -> ()
    %cst_25 = arith.constant dense<0.000000e+00> : vector<2x8x8xf32>
    %60 = tpu.matmul %57, %58, %cst_25 {dimension_numbers = #tpu.dot_dimension_numbers<[2], [2], [1], [1], [0, 0, 0, 1, 1, 1], [0], [0]>} : vector<2x8x8xf32>, vector<2x8x8xf32>, vector<2x8x8xf32> -> vector<2x8x8xf32>
    "tpu.trace_stop"() : () -> ()
    %cst_26 = arith.constant dense<0xFF800000> : vector<2x8xf32>
    %61 = vector.multi_reduction <maximumf>, %60, %cst_26 [2] : vector<2x8x8xf32> to vector<2x8xf32>
    %62 = vector.shape_cast %61 : vector<2x8xf32> to vector<2x8x1xf32>
    %63 = vector.broadcast %62 : vector<2x8x1xf32> to vector<2x8x8xf32>
    %64 = arith.subf %60, %63 : vector<2x8x8xf32>
    %65 = math.exp %64 : vector<2x8x8xf32>
    %cst_27 = arith.constant dense<0.000000e+00> : vector<2x8xf32>
    %66 = vector.multi_reduction <add>, %65, %cst_27 [2] : vector<2x8x8xf32> to vector<2x8xf32>
    %67 = vector.shape_cast %66 : vector<2x8xf32> to vector<2x8x1xf32>
    %68 = tpu.reciprocal %67 {approx = true} : vector<2x8x1xf32> -> vector<2x8x1xf32>
    %69 = vector.broadcast %68 : vector<2x8x1xf32> to vector<2x8x8xf32>
    %70 = arith.mulf %65, %69 : vector<2x8x8xf32>
    "tpu.trace_start"() <{level = 10 : i32, message = "bqk,bkd->bqd"}> : () -> ()
    %cst_28 = arith.constant dense<0.000000e+00> : vector<2x8x8xf32>
    %71 = tpu.matmul %70, %59, %cst_28 {dimension_numbers = #tpu.dot_dimension_numbers<[2], [1], [1], [2], [0, 0, 0, 1, 1, 2], [0], [0]>} : vector<2x8x8xf32>, vector<2x8x8xf32>, vector<2x8x8xf32> -> vector<2x8x8xf32>
    "tpu.trace_stop"() : () -> ()
    %72 = vector.shape_cast %71 : vector<2x8x8xf32> to vector<16x8xf32>
    %73 = vector.extract_strided_slice %2 {offsets = [16, 0], sizes = [8, 32], strides = [1, 1]} : vector<32x32xf32> to vector<8x32xf32>
    %cst_29 = arith.constant dense<0.000000e+00> : vector<16x32xf32>
    %74 = tpu.matmul %72, %73, %cst_29 {dimension_numbers = #tpu.dot_dimension_numbers<[1], [0], [0], [1], [0, 0, 1, 1], [], []>} : vector<16x8xf32>, vector<8x32xf32>, vector<16x32xf32> -> vector<16x32xf32>
    %75 = arith.addf %56, %74 : vector<16x32xf32>
    %76 = vector.extract_strided_slice %13 {offsets = [0, 0, 24], sizes = [2, 8, 8], strides = [1, 1, 1]} : vector<2x8x32xf32> to vector<2x8x8xf32>
    %77 = vector.extract_strided_slice %15 {offsets = [0, 0, 24], sizes = [2, 8, 8], strides = [1, 1, 1]} : vector<2x8x32xf32> to vector<2x8x8xf32>
    %78 = vector.extract_strided_slice %17 {offsets = [0, 0, 24], sizes = [2, 8, 8], strides = [1, 1, 1]} : vector<2x8x32xf32> to vector<2x8x8xf32>
    "tpu.trace_start"() <{level = 10 : i32, message = "bqd,bkd->bqk"}> : () -> ()
    %cst_30 = arith.constant dense<0.000000e+00> : vector<2x8x8xf32>
    %79 = tpu.matmul %76, %77, %cst_30 {dimension_numbers = #tpu.dot_dimension_numbers<[2], [2], [1], [1], [0, 0, 0, 1, 1, 1], [0], [0]>} : vector<2x8x8xf32>, vector<2x8x8xf32>, vector<2x8x8xf32> -> vector<2x8x8xf32>
    "tpu.trace_stop"() : () -> ()
    %cst_31 = arith.constant dense<0xFF800000> : vector<2x8xf32>
    %80 = vector.multi_reduction <maximumf>, %79, %cst_31 [2] : vector<2x8x8xf32> to vector<2x8xf32>
    %81 = vector.shape_cast %80 : vector<2x8xf32> to vector<2x8x1xf32>
    %82 = vector.broadcast %81 : vector<2x8x1xf32> to vector<2x8x8xf32>
    %83 = arith.subf %79, %82 : vector<2x8x8xf32>
    %84 = math.exp %83 : vector<2x8x8xf32>
    %cst_32 = arith.constant dense<0.000000e+00> : vector<2x8xf32>
    %85 = vector.multi_reduction <add>, %84, %cst_32 [2] : vector<2x8x8xf32> to vector<2x8xf32>
    %86 = vector.shape_cast %85 : vector<2x8xf32> to vector<2x8x1xf32>
    %87 = tpu.reciprocal %86 {approx = true} : vector<2x8x1xf32> -> vector<2x8x1xf32>
    %88 = vector.broadcast %87 : vector<2x8x1xf32> to vector<2x8x8xf32>
    %89 = arith.mulf %84, %88 : vector<2x8x8xf32>
    "tpu.trace_start"() <{level = 10 : i32, message = "bqk,bkd->bqd"}> : () -> ()
    %cst_33 = arith.constant dense<0.000000e+00> : vector<2x8x8xf32>
    %90 = tpu.matmul %89, %78, %cst_33 {dimension_numbers = #tpu.dot_dimension_numbers<[2], [1], [1], [2], [0, 0, 0, 1, 1, 2], [0], [0]>} : vector<2x8x8xf32>, vector<2x8x8xf32>, vector<2x8x8xf32> -> vector<2x8x8xf32>
    "tpu.trace_stop"() : () -> ()
    %91 = vector.shape_cast %90 : vector<2x8x8xf32> to vector<16x8xf32>
    %92 = vector.extract_strided_slice %2 {offsets = [24, 0], sizes = [8, 32], strides = [1, 1]} : vector<32x32xf32> to vector<8x32xf32>
    %cst_34 = arith.constant dense<0.000000e+00> : vector<16x32xf32>
    %93 = tpu.matmul %91, %92, %cst_34 {dimension_numbers = #tpu.dot_dimension_numbers<[1], [0], [0], [1], [0, 0, 1, 1], [], []>} : vector<16x8xf32>, vector<8x32xf32>, vector<16x32xf32> -> vector<16x32xf32>
    %94 = arith.addf %75, %93 : vector<16x32xf32>
    %c0_35 = arith.constant 0 : index
    %c0_36 = arith.constant 0 : index
    %95 = vector.load %arg7[%c0_35, %c0_36] : memref<1x32xf32, #tpu.memory_space<vmem>>, vector<1x32xf32>
    %96 = vector.broadcast %95 : vector<1x32xf32> to vector<16x32xf32>
    %97 = arith.addf %94, %96 : vector<16x32xf32>
    %c0_37 = arith.constant 0 : index
    %c0_38 = arith.constant 0 : index
    %98 = vector.load %arg8[%c0_37, %c0_38] : memref<16x32xf32, #tpu.memory_space<vmem>>, vector<16x32xf32>
    tpu.vector_store %arg8[%c0_37, %c0_38], %97 {strides = array<i32>} : memref<16x32xf32, #tpu.memory_space<vmem>>, vector<16x32xf32>,
    return
  }
}

</mosaic_0001>

<bundles_post_ra>
// kernel: tpu_custom_call.1
= control target key start
LH: loop header
LB: loop body
LE: loop exit
PB: predicated region body
PF: predicated region fallthrough
CT: control target
= control target key end

     0   :  { %13 = vsyncpa [#allocation3], 0  ;;  %s1313_s0 = inlined_call_operand.hbm [shape: f32[16,32], index: 0, kind: input, shape index: {}]   ;;  %s1314_s1 = inlined_call_operand.hbm [shape: f32[16,32], index: 1, kind: input, shape index: {}]   ;;  %s1315_s2 = inlined_call_operand.hbm [shape: f32[32,32], index: 2, kind: input, shape index: {}]   ;;  %s1316_s3 = inlined_call_operand.vmem [shape: f32[1,32], index: 3, kind: input, shape index: {}]   ;;  %s1317_s4 = inlined_call_operand.hbm [shape: f32[32,64], index: 4, kind: input, shape index: {}]   ;;  %s1318_s5 = inlined_call_operand.vmem [shape: f32[1,64], index: 5, kind: input, shape index: {}]   ;;  %s1319_s6 = inlined_call_operand.hbm [shape: f32[32,32], index: 6, kind: input, shape index: {}]   ;;  %s1320_s7 = inlined_call_operand.vmem [shape: f32[1,32], index: 7, kind: input, shape index: {}]   ;;  %s1321_s8 = inlined_call_operand.hbm [shape: f32[16,32], index: 8, kind: output, shape index: {}]  }
   0x1   :  { %14 = vsyncpa [#allocation6], 0 }
   0x2   :  { %15 = vsyncpa [#allocation9], 0 }
   0x3   :  { %16 = vsyncpa [#allocation4], 0  ;;  %s34_s29 = sshll.u32 %s1314_s1, 4  ;;  %s1104_s30 = smov [#allocation5]   ;;  %s35_s29 = int_to_ptr.hbm [resolvable:$true] %s34_s29 }
   0x4   :  { %s36_s9 = sshll.u32 %s1104_s30, 4  ;;  %s62_s12 = sshll.u32 %s1317_s4, 4  ;;  %s37_s9 = int_to_ptr.vmem [resolvable:$true] %s36_s9  ;;  %s63_s12 = int_to_ptr.hbm [resolvable:$true] %s62_s12 }
   0x5   :  { %s1105_s13 = smov 128   ;;  %s1106_s14 = smov 8  }
   0x6   :  { %42 = dma.hbm_to_vmem [thread:$0]  %s35_s29, 256, %s37_s9, [#allocation6], %s1105_s13, %s1105_s13, %s1106_s14  }
   0x7   :  { %s1107_s15 = smov [#allocation8]   ;;  %s21_s1 = sshll.u32 %s1313_s0, 4  ;;  %s22_s1 = int_to_ptr.hbm [resolvable:$true] %s21_s1 }
   0x8   :  { %s64_s16 = sshll.u32 %s1107_s15, 4  ;;  %s47_s20 = sshll.u32 %s1315_s2, 4  ;;  %s65_s16 = int_to_ptr.vmem [resolvable:$true] %s64_s16  ;;  %s48_s20 = int_to_ptr.hbm [resolvable:$true] %s47_s20 }
   0x9   :  { %70 = dma.hbm_to_vmem [thread:$0]  %s63_s12, 512, %s65_s16, [#allocation9], %s1105_s13, %s1105_s13, %s1106_s14  }
   0xa   :  { %s1108_s21 = smov [#allocation2]   ;;  %s1109_s23 = smov [#allocation7]  }
   0xb   :  { %s23_s22 = sshll.u32 %s1108_s21, 4  ;;  %s49_s0 = sshll.u32 %s1109_s23, 4  ;;  %s24_s22 = int_to_ptr.vmem [resolvable:$true] %s23_s22  ;;  %s50_s0 = int_to_ptr.vmem [resolvable:$true] %s49_s0 }
   0xc   :  { %29 = dma.hbm_to_vmem [thread:$0]  %s22_s1, 256, %s24_s22, [#allocation3], %s1105_s13, %s1105_s13, %s1106_s14  }
   0xd   :  { %s77_s26 = sshll.u32 %s1319_s6, 4  ;;  %s1110_s2 = smov [#allocation10]   ;;  %s78_s26 = int_to_ptr.hbm [resolvable:$true] %s77_s26 }
   0xe   :  { %55 = dma.hbm_to_vmem [thread:$0]  %s48_s20, 512, %s50_s0, [#allocation6], %s1105_s13, %s1105_s13, %s1106_s14  }
   0xf   :  { %s79_s27 = sshll.u32 %s1110_s2, 4  ;;  %s80_s27 = int_to_ptr.vmem [resolvable:$true] %s79_s27 }
  0x10   :  { %85 = dma.hbm_to_vmem [thread:$0]  %s78_s26, 512, %s80_s27, [#allocation9], %s1105_s13, %s1105_s13, %s1106_s14  }
  0x11   :  { %1096 = dma.done.wait [#allocation3], 256  }
  0x12   :  { %1097 = vsyncadd [#allocation3], 4294967040 }
  0x13   :  { %1098 = dma.done.wait [#allocation6], 768  }
  0x14   :  { %1099 = vsyncadd [#allocation6], 4294966528 }
  0x15   :  { %1100 = dma.done.wait [#allocation9], 1024  }
  0x16   :  { %1101 = vsyncadd [#allocation9], 4294966272  ;;  %v119_v0 = vld [vmem:[#allocation7 + $0x18] sm:$0xff]  ;;  %v118_v1 = vld [vmem:[#allocation7 + $0x10] sm:$0xff]  ;;  %vm124_vm0 = vcmask 261120   ;;  %s1111_s29 = smov 120  }
  0x17   :  { %893 = vmatpush.msra.mxu1 %v119_v0  ;;  %143 = vmatpush.msra.mxu0 %v119_v0  ;;  %v117_v2 = vld [vmem:[#allocation7 + $0x8] sm:$0xff]  ;;  %v116_v3 = vld [vmem:[#allocation7] sm:$0xff]  ;;  %v157_v6 = vld [vmem:[#allocation8 + $0x18] sm:$0xff]  ;;  %vm191_vm1 = vcmask 64512   ;;  %s1112_s10 = smov 96   ;;  %s1115_s11 = smov 104  }
  0x18   :  { %v109_v4 = vld [vmem:[#allocation2 + $0x8] sm:$0xff]  ;;  %v108_v5 = vld [vmem:[#allocation2] sm:$0xff]  ;;  %v156_v7 = vld [vmem:[#allocation8 + $0x10] sm:$0xff]  ;;  %s1116_s12 = smov 80   ;;  %s1117_s15 = smov 72  }
  0x19   :  { %894 = vmatpush.msra.mxu1 %v118_v1  ;;  %144 = vmatpush.msra.mxu0 %v118_v1  ;;  %v155_v8 = vld [vmem:[#allocation8 + $0x8] sm:$0xff]  ;;  %v154_v9 = vld [vmem:[#allocation8] sm:$0xff]  ;;  %v110_v10 = vld [vmem:[#allocation5] sm:$0xff]  ;;  %s1118_s18 = smov [#allocation11]   ;;  %s842_s20 = sshll.u32 %s1321_s8, 4  ;;  %s843_s20 = int_to_ptr.hbm [resolvable:$true] %s842_s20 }
  0x1a   :  { %v111_v11 = vld [vmem:[#allocation5 + $0x8] sm:$0xff]  ;;  %v917_v12 = vld [vmem:[%s1316_s3] ss:$0 sm:$0xff]  ;;  %s1113_s3 = smov 112   ;;  %s840_s1 = sshll.u32 %s1118_s18, 4  ;;  %s841_s1 = int_to_ptr.vmem [resolvable:$true] %s840_s1 }
  0x1b   :  { %895 = vmatpush.msra.mxu1 %v117_v2  ;;  %145 = vmatpush.msra.mxu0 %v117_v2  ;;  %v918_v16 = vld [vmem:[%s1318_s5] ss:$0 sm:$0xff]  ;;  %s1114_s5 = smov 88   ;;  %v113_v2 = vld [vmem:[#allocation10 + $0x8] sm:$0xff] }
  0x1c   :  { %v112_v54 = vld [vmem:[#allocation10] sm:$0xff] }
  0x1d   :  { %896 = vmatpush.msra.mxu1 %v116_v3  ;;  %146 = vmatpush.msra.mxu0 %v116_v3 }
  0x1e   :  { %858 = vmatmul.msk.f32.vlgmr.msra.gmra.mxu1 %vm124_vm0, %v109_v4  ;;  %857 = vmatmul.msk.f32.vlgmr.msra.gmra.mxu0 %vm124_vm0, %v108_v5 }
  0x1f   :  { %180 = vmatpush.msrb.mxu1 %v157_v6 }
  0x21   :  { %181 = vmatpush.msrb.mxu1 %v156_v7 }
  0x23   :  { %182 = vmatpush.msrb.mxu1 %v155_v8 }
  0x25   :  { %183 = vmatpush.msrb.mxu1 %v154_v9 }
  0x26   :  { %859 = vmatmul.msk.f32.vlgmr.msrb.gmra.mxu1 %vm124_vm0, %v110_v10 }
  0x2e   :  { %860 = vmatmul.msk.f32.gmra.mxu1 %vm124_vm0, %v111_v11 }
  0x9b   :  { %v151_v13 = vpop.f32.mrf.mxu1  ;;  %v148_v14 = vpop.f32.mrf.mxu0 }
  0x9c   :  { %v1201_v15 = vadd.f32 %v917_v12, %v148_v14  ;;  %v1222_v21 = vadd.f32 %v917_v12, %v151_v13 }
  0x9e   :  { %318 = vrot.lane.b32.xlu2 %v1201_v15, %s1111_s29 }
  0xa3   :  { %v185_v17 = vpop.f32.mrf.mxu1 }
  0xa4   :  { %v1208_v18 = vadd.f32 %v918_v16, %v185_v17 }
  0xa6   :  { %266 = vrot.lane.b32.xlu1 %v1208_v18, %s1112_s10  ;;  %861 = vmatpush.xpose.msk.msra.mxu2 %vm191_vm1, %v1208_v18 }
  0xa9   :  { %862 = vmatmul.msk.f32.vlgmr.msra.gmra.mxu2 %vm191_vm1, %v1201_v15 }
  0xab   :  { %v188_v19 = vpop.f32.mrf.mxu1 }
  0xac   :  { %v1216_v20 = vadd.f32 %v918_v16, %v188_v19 }
  0xae   :  { %863 = vmatpush.xpose.msk.msra.mxu3 %vm191_vm1, %v1216_v20  ;;  %320 = vrot.lane.b32.xlu1 %v1208_v18, %s1111_s29 }
  0xb1   :  { %864 = vmatmul.msk.f32.vlgmr.msra.gmra.mxu3 %vm191_vm1, %v1222_v21 }
  0xf8   :  { %v319_v28 = vpop.permute.xlu2 %318 }
 0x118   :  { %v267_v22 = vpop.permute.xlu1 %266 }
 0x119   :  { %287 = vmatpush.msrb.mxu2 %v267_v22 }
 0x120   :  { %v321_v23 = vpop.permute.xlu1 %320 }
 0x121   :  { %867 = vmatpush.xpose.msk.msra.mxu2 %vm191_vm1, %v321_v23 }
 0x12c   :  { %v215_v24 = vpop.f32.mrf.mxu2 }
 0x12d   :  { %v244_v25 = vsel %vm191_vm1, %v215_v24, -inf }
 0x12e   :  { %245 = vmax.xlane.f32.xlu0 %v244_v25 }
 0x134   :  { %v241_v26 = vpop.f32.mrf.mxu3 }
 0x135   :  { %v247_v27 = vsel %vm191_vm1, %v241_v26, -inf }
 0x136   :  { %248 = vmax.xlane.f32.xlu2 %v247_v27 }
 0x1a1   :  { %v246_v29 = vpop.xlane.xlu0 %245 }
 0x1a2   :  { %v250_v30 = vsub.f32 %v215_v24, %v246_v29 }
 0x1a4   :  { %v252_v31 = vmul.f32 1.442695, %v250_v30 }
 0x1a6   :  { %920 = vpow2.f32 %v252_v31 }
 0x1a9   :  { %v249_v32 = vpop.xlane.xlu2 %248 }
 0x1aa   :  { %v251_v33 = vsub.f32 %v241_v26, %v249_v32 }
 0x1ac   :  { %v921_v34 = vpop.eup %920  ;;  %v254_v35 = vmul.f32 1.442695, %v251_v33 }
 0x1ad   :  { %v256_v36 = vsel %vm191_vm1, %v921_v34, 0.0 }
 0x1ae   :  { %922 = vpow2.f32 %v254_v35  ;;  %257 = vadd.xlane.f32.xlu0 %v256_v36 }
 0x1b4   :  { %v923_v37 = vpop.eup %922 }
 0x1b5   :  { %v259_v38 = vsel %vm191_vm1, %v923_v37, 0.0 }
 0x1b6   :  { %260 = vadd.xlane.f32.xlu1 %v259_v38 }
 0x1cf   :  { %508 = vrot.lane.b32.xlu1 %v1208_v18, %s1113_s3 }
 0x221   :  { %v258_v39 = vpop.xlane.xlu0 %257 }
 0x222   :  { %924 = vrcp.f32 %v258_v39 }
 0x228   :  { %v925_v40 = vpop.eup %924 }
 0x229   :  { %v264_v41 = vmul.f32 %v925_v40, %v921_v34  ;;  %v261_v48 = vpop.xlane.xlu1 %260 }
 0x22b   :  { %865 = vmatmul.msk.f32.vlgmr.msrb.gmra.mxu2 %vm191_vm1, %v264_v41 }
 0x22c   :  { %469 = vmatpush.msrb.mxu2 %v113_v2 }
 0x233   :  { %868 = vmatmul.msk.f32.vlgmr.msra.gmra.mxu2 %vm191_vm1, %v319_v28 }
 0x241   :  { %v509_v61 = vpop.permute.xlu1 %508 }
 0x2ae   :  { %v289_v42 = vpop.f32.mrf.mxu2 }
 0x2b6   :  { %v343_v43 = vpop.f32.mrf.mxu2 }
 0x2b7   :  { %v374_v44 = vsel %vm191_vm1, %v343_v43, -inf }
 0x2b8   :  { %375 = vmax.xlane.f32.xlu0 %v374_v44 }
 0x2cc   :  { %292 = vrot.lane.b32.xlu0 %v1216_v20, %s1112_s10 }
 0x2d4   :  { %348 = vrot.lane.b32.xlu0 %v1216_v20, %s1111_s29 }
 0x2dc   :  { %346 = vrot.lane.b32.xlu0 %v1222_v21, %s1111_s29 }
 0x2e4   :  { %506 = vrot.lane.b32.xlu0 %v1201_v15, %s1113_s3 }
 0x32b   :  { %v376_v45 = vpop.xlane.xlu0 %375 }
 0x32c   :  { %v380_v46 = vsub.f32 %v343_v43, %v376_v45  ;;  %v114_v43 = vld [vmem:[#allocation10 + $0x10] sm:$0xff] }
 0x32d   :  { %657 = vmatpush.msra.mxu2 %v114_v43 }
 0x32e   :  { %v382_v47 = vmul.f32 1.442695, %v380_v46 }
 0x330   :  { %926 = vpow2.f32 %v382_v47 }
 0x331   :  { %928 = vrcp.f32 %v261_v48 }
 0x336   :  { %v927_v49 = vpop.eup %926 }
 0x337   :  { %v386_v50 = vsel %vm191_vm1, %v927_v49, 0.0  ;;  %v929_v51 = vpop.eup %928 }
 0x338   :  { %387 = vadd.xlane.f32.xlu2 %v386_v50  ;;  %v265_v53 = vmul.f32 %v929_v51, %v923_v37 }
 0x33e   :  { %v293_v52 = vpop.permute.xlu0 %292 }
 0x33f   :  { %313 = vmatpush.msrb.mxu3 %v293_v52 }
 0x340   :  { %866 = vmatmul.msk.f32.vlgmr.msrb.gmra.mxu3 %vm191_vm1, %v265_v53 }
 0x346   :  { %v349_v55 = vpop.permute.xlu0 %348 }
 0x347   :  { %869 = vmatpush.xpose.msk.msra.mxu3 %vm191_vm1, %v349_v55 }
 0x34b   :  { %498 = vmatpush.msrb.mxu3 %v112_v54 }
 0x34e   :  { %v347_v56 = vpop.permute.xlu0 %346 }
 0x34f   :  { %870 = vmatmul.msk.f32.vlgmr.msra.gmra.mxu3 %vm191_vm1, %v347_v56 }
 0x350   :  { %396 = vrot.lane.b32.xlu2 %v1208_v18, %s1114_s5 }
 0x356   :  { %v507_v62 = vpop.permute.xlu0 %506 }
 0x357   :  { %875 = vmatmul.msk.f32.vlgmr.msrb.gmra.mxu3 %vm191_vm1, %v289_v42  ;;  %v912_v42 = vpack.i.bf16 %v1216_v20, %v1208_v18 }
 0x3ab   :  { %v388_v57 = vpop.xlane.xlu2 %387 }
 0x3ac   :  { %930 = vrcp.f32 %v388_v57 }
 0x3b2   :  { %v931_v58 = vpop.eup %930 }
 0x3b3   :  { %v397_v59 = vpop.permute.xlu2 %396  ;;  %v394_v60 = vmul.f32 %v931_v58, %v927_v49 }
 0x3b4   :  { %417 = vmatpush.msrb.mxu0 %v397_v59 }
 0x3b5   :  { %871 = vmatmul.msk.f32.vlgmr.msrb.gmra.mxu0 %vm191_vm1, %v394_v60 }
 0x3b6   :  { %877 = vmatpush.xpose.msk.msra.mxu0 %vm191_vm1, %v509_v61 }
 0x3bd   :  { %878 = vmatmul.msk.f32.vlgmr.msra.gmra.mxu0 %vm191_vm1, %v507_v62 }
 0x3c3   :  { %v315_v63 = vpop.f32.mrf.mxu3 }
 0x3c4   :  { %876 = vmatmul.msk.f32.gmra.mxu3 %vm191_vm1, %v315_v63 }
 0x3d2   :  { %v371_v0 = vpop.f32.mrf.mxu3 }
 0x3d3   :  { %v377_v1 = vsel %vm191_vm1, %v371_v0, -inf }
 0x3d4   :  { %378 = vmax.xlane.f32.xlu0 %v377_v1 }
 0x3da   :  { %v1274_v27 = vpop.f32.mrf.mxu3 }
 0x3e8   :  { %422 = vrot.lane.b32.xlu0 %v1216_v20, %s1114_s5 }
 0x3f0   :  { %669 = vrot.lane.b32.xlu0 %v1208_v18, %s1115_s11 }
 0x3f8   :  { %584 = vrot.lane.b32.xlu0 %v1208_v18, %s1116_s12 }
 0x400   :  { %667 = vrot.lane.b32.xlu0 %v1201_v15, %s1115_s11 }
 0x408   :  { %695 = vrot.lane.b32.xlu0 %v1222_v21, %s1115_s11 }
 0x432   :  { %v419_v3 = vpop.f32.mrf.mxu0 }
 0x433   :  { %873 = vmatmul.msk.f32.vlgmr.msrb.gmra.mxu2 %vm191_vm1, %v419_v3 }
 0x43a   :  { %v531_v4 = vpop.f32.mrf.mxu0 }
 0x43b   :  { %v562_v5 = vsel %vm191_vm1, %v531_v4, -inf }
 0x43c   :  { %563 = vmax.xlane.f32.xlu2 %v562_v5 }
 0x447   :  { %v379_v6 = vpop.xlane.xlu0 %378  ;;  %v1277_v29 = vpop.f32.mrf.mxu3 }
 0x448   :  { %v381_v7 = vsub.f32 %v371_v0, %v379_v6 }
 0x44a   :  { %v384_v8 = vmul.f32 1.442695, %v381_v7 }
 0x44c   :  { %932 = vpow2.f32 %v384_v8 }
 0x452   :  { %v933_v9 = vpop.eup %932 }
 0x453   :  { %v389_v10 = vsel %vm191_vm1, %v933_v9, 0.0 }
 0x454   :  { %390 = vadd.xlane.f32.xlu1 %v389_v10 }
 0x45a   :  { %v423_v11 = vpop.permute.xlu0 %422 }
 0x45b   :  { %443 = vmatpush.msra.mxu1 %v423_v11 }
 0x462   :  { %v670_v12 = vpop.permute.xlu0 %669 }
 0x463   :  { %885 = vmatpush.xpose.msk.msra.mxu3 %vm191_vm1, %v670_v12 }
 0x46a   :  { %v585_v13 = vpop.permute.xlu0 %584 }
 0x46b   :  { %605 = vmatpush.msrb.mxu0 %v585_v13 }
 0x46d   :  { %536 = vrot.lane.b32.xlu1 %v1216_v20, %s1113_s3 }
 0x472   :  { %v668_v14 = vpop.permute.xlu0 %667 }
 0x473   :  { %886 = vmatmul.msk.f32.vlgmr.msra.gmra.mxu3 %vm191_vm1, %v668_v14 }
 0x475   :  { %697 = vrot.lane.b32.xlu1 %v1216_v20, %s1115_s11 }
 0x4af   :  { %v564_v15 = vpop.xlane.xlu2 %563 }
 0x4b0   :  { %v568_v16 = vsub.f32 %v531_v4, %v564_v15  ;;  %v919_v15 = vld [vmem:[%s1320_s7] ss:$0 sm:$0xff] }
 0x4b2   :  { %v570_v17 = vmul.f32 1.442695, %v568_v16 }
 0x4b4   :  { %934 = vpow2.f32 %v570_v17 }
 0x4b6   :  { %v471_v10 = vpop.f32.mrf.mxu2 }
 0x4b7   :  { %v501_v13 = vadd.f32 %v1274_v27, %v471_v10 }
 0x4ba   :  { %v935_v19 = vpop.eup %934 }
 0x4bb   :  { %v574_v22 = vsel %vm191_vm1, %v935_v19, 0.0 }
 0x4bc   :  { %575 = vadd.xlane.f32.xlu2 %v574_v22 }
 0x4c7   :  { %v391_v23 = vpop.xlane.xlu1 %390 }
 0x4c8   :  { %936 = vrcp.f32 %v391_v23 }
 0x4ce   :  { %v937_v24 = vpop.eup %936 }
 0x4cf   :  { %v395_v25 = vmul.f32 %v937_v24, %v933_v9 }
 0x4d1   :  { %872 = vmatmul.msk.f32.vlgmr.msra.gmra.mxu1 %vm191_vm1, %v395_v25 }
 0x4d4   :  { %534 = vrot.lane.b32.xlu2 %v1222_v21, %s1113_s3  ;;  %v696_v21 = vpop.permute.xlu0 %695 }
 0x4df   :  { %v537_v26 = vpop.permute.xlu1 %536 }
 0x4e0   :  { %879 = vmatpush.xpose.msk.msrb.mxu1 %vm191_vm1, %v537_v26 }
 0x4e7   :  { %v698_v28 = vpop.permute.xlu1 %697 }
 0x4e8   :  { %887 = vmatpush.xpose.msk.msra.mxu0 %vm191_vm1, %v698_v28 }
 0x4f6   :  { %v692_v30 = vpop.f32.mrf.mxu3 }
 0x4f7   :  { %v723_v31 = vsel %vm191_vm1, %v692_v30, -inf }
 0x4f8   :  { %724 = vmax.xlane.f32.xlu1 %v723_v31 }
 0x52f   :  { %v576_v32 = vpop.xlane.xlu2 %575 }
 0x530   :  { %938 = vrcp.f32 %v576_v32 }
 0x536   :  { %v939_v33 = vpop.eup %938 }
 0x537   :  { %v582_v34 = vmul.f32 %v939_v33, %v935_v19  ;;  %v535_v35 = vpop.permute.xlu2 %534 }
 0x538   :  { %880 = vmatmul.msk.f32.vlgmr.msrb.gmra.mxu1 %vm191_vm1, %v535_v35 }
 0x539   :  { %881 = vmatmul.msk.f32.vlgmr.msrb.gmra.mxu0 %vm191_vm1, %v582_v34 }
 0x541   :  { %888 = vmatmul.msk.f32.vlgmr.msra.gmra.mxu0 %vm191_vm1, %v696_v21 }
 0x54e   :  { %v445_v36 = vpop.f32.mrf.mxu1 }
 0x54f   :  { %874 = vmatmul.msk.f32.gmra.mxu2 %vm191_vm1, %v445_v36 }
 0x56b   :  { %v725_v37 = vpop.xlane.xlu1 %724 }
 0x56c   :  { %v729_v38 = vsub.f32 %v692_v30, %v725_v37 }
 0x56e   :  { %v731_v39 = vmul.f32 1.442695, %v729_v38 }
 0x570   :  { %940 = vpow2.f32 %v731_v39 }
 0x576   :  { %v941_v40 = vpop.eup %940 }
 0x577   :  { %v735_v41 = vsel %vm191_vm1, %v941_v40, 0.0 }
 0x578   :  { %736 = vadd.xlane.f32.xlu1 %v735_v41 }
 0x591   :  { %913 = vrot.lane.b32.xlu1 %v912_v42, %s1117_s15 }
 0x5b5   :  { %v559_v44 = vpop.f32.mrf.mxu1 }
 0x5b6   :  { %v607_v45 = vpop.f32.mrf.mxu0  ;;  %v565_v46 = vsel %vm191_vm1, %v559_v44, -inf }
 0x5b7   :  { %566 = vmax.xlane.f32.xlu2 %v565_v46  ;;  %883 = vmatmul.msk.f32.vlgmr.msra.gmra.mxu2 %vm191_vm1, %v607_v45 }
 0x5be   :  { %v720_v47 = vpop.f32.mrf.mxu0 }
 0x5bf   :  { %v726_v48 = vsel %vm191_vm1, %v720_v47, -inf }
 0x5c0   :  { %727 = vmax.xlane.f32.xlu0 %v726_v48 }
 0x5d2   :  { %v474_v11 = vpop.f32.mrf.mxu2 }
 0x5d3   :  { %v504_v23 = vadd.f32 %v1277_v29, %v474_v11 }
 0x5eb   :  { %v737_v49 = vpop.xlane.xlu1 %736 }
 0x603   :  { %v914_v50 = vpop.permute.xlu1 %913 }
 0x604   :  { %v916_v51 = vunpack.i.h.bf16 %v914_v50  ;;  %v915_v1 = vunpack.i.l.bf16 %v914_v50 }
 0x606   :  { %792 = vmatpush.msrb.mxu3 %v916_v51 }
 0x62a   :  { %v567_v18 = vpop.xlane.xlu2 %566 }
 0x62b   :  { %v569_v52 = vsub.f32 %v559_v44, %v567_v18 }
 0x62d   :  { %v572_v53 = vmul.f32 1.442695, %v569_v52 }
 0x62f   :  { %942 = vpow2.f32 %v572_v53 }
 0x633   :  { %v728_v54 = vpop.xlane.xlu0 %727 }
 0x634   :  { %v730_v55 = vsub.f32 %v720_v47, %v728_v54 }
 0x635   :  { %v943_v56 = vpop.eup %942 }
 0x636   :  { %v733_v57 = vmul.f32 1.442695, %v730_v55  ;;  %v577_v58 = vsel %vm191_vm1, %v943_v56, 0.0 }
 0x637   :  { %578 = vadd.xlane.f32.xlu2 %v577_v58 }
 0x638   :  { %944 = vpow2.f32 %v733_v57 }
 0x63a   :  { %v659_v12 = vpop.f32.mrf.mxu2 }
 0x63b   :  { %v665_v14 = vadd.f32 %v659_v12, %v501_v13 }
 0x63e   :  { %v945_v59 = vpop.eup %944 }
 0x63f   :  { %v738_v60 = vsel %vm191_vm1, %v945_v59, 0.0 }
 0x640   :  { %739 = vadd.xlane.f32.xlu0 %v738_v60 }
 0x64f   :  { %610 = vrot.lane.b32.xlu2 %v1216_v20, %s1116_s12  ;;  %v115_v20 = vld [vmem:[#allocation10 + $0x18] sm:$0xff] }
 0x650   :  { %818 = vmatpush.msrb.mxu0 %v115_v20 }
 0x6aa   :  { %v579_v61 = vpop.xlane.xlu2 %578 }
 0x6ab   :  { %946 = vrcp.f32 %v579_v61 }
 0x6ac   :  { %948 = vrcp.f32 %v737_v49 }
 0x6b1   :  { %v947_v62 = vpop.eup %946 }
 0x6b2   :  { %v583_v63 = vmul.f32 %v947_v62, %v943_v56  ;;  %v611_v0 = vpop.permute.xlu2 %610  ;;  %v949_v3 = vpop.eup %948 }
 0x6b3   :  { %631 = vmatpush.msra.mxu1 %v611_v0  ;;  %v740_v2 = vpop.xlane.xlu0 %739  ;;  %v743_v5 = vmul.f32 %v949_v3, %v941_v40 }
 0x6b4   :  { %950 = vrcp.f32 %v740_v2  ;;  %882 = vmatmul.msk.f32.vlgmr.msra.gmra.mxu1 %vm191_vm1, %v583_v63 }
 0x6b5   :  { %766 = vmatpush.msrb.mxu1 %v915_v1 }
 0x6ba   :  { %v951_v4 = vpop.eup %950 }
 0x6bb   :  { %v744_v6 = vmul.f32 %v951_v4, %v945_v59 }
 0x6bc   :  { %889 = vmatmul.msk.f32.vlgmr.msrb.gmra.mxu1 %vm191_vm1, %v743_v5 }
 0x6bd   :  { %890 = vmatmul.msk.f32.vlgmr.msrb.gmra.mxu3 %vm191_vm1, %v744_v6 }
 0x731   :  { %v633_v7 = vpop.f32.mrf.mxu1 }
 0x732   :  { %884 = vmatmul.msk.f32.gmra.mxu2 %vm191_vm1, %v633_v7 }
 0x739   :  { %v768_v8 = vpop.f32.mrf.mxu1 }
 0x73a   :  { %891 = vmatmul.msk.f32.vlgmr.msrb.gmra.mxu0 %vm191_vm1, %v768_v8 }
 0x740   :  { %v794_v9 = vpop.f32.mrf.mxu3 }
 0x742   :  { %892 = vmatmul.msk.f32.gmra.mxu0 %vm191_vm1, %v794_v9 }
 0x7b5   :  { %v662_v22 = vpop.f32.mrf.mxu2 }
 0x7b6   :  { %v666_v24 = vadd.f32 %v662_v22, %v504_v23 }
 0x7b7   :  { %v820_v16 = vpop.f32.mrf.mxu0 }
 0x7b8   :  { %v826_v17 = vadd.f32 %v820_v16, %v665_v14 }
 0x7ba   :  { %v832_v19 = vadd.f32 %v919_v15, %v826_v17 }
 0x7bc   :  { %834 = vst.msk [vmem:[#allocation11] sm:$0xff] %vm124_vm0, %v832_v19 }
 0x7bf   :  { %v823_v25 = vpop.f32.mrf.mxu0 }
 0x7c0   :  { %v827_v26 = vadd.f32 %v823_v25, %v666_v24 }
 0x7c2   :  { %v833_v27 = vadd.f32 %v919_v15, %v827_v26 }
 0x7c4   :  { %835 = vst.msk [vmem:[#allocation11 + $0x8] sm:$0xff] %vm124_vm0, %v833_v27 }
 0x7c5   :  { %848 = dma.vmem_to_hbm [thread:$0]  %s841_s1, 256, %s843_s20, [#allocation4], %s1105_s13, %s1105_s13, %s1106_s14  }
 0x7c6   :  { %1102 = dma.done.wait [#allocation4], 256  }
 0x7c7   :  { %1103 = vsyncadd [#allocation4], 4294967040 }
 0x7c8   :  { %853 = vsyncpa [#allocation3], 1 }
 0x7c9   :  { %854 = vsyncpa [#allocation6], 1 }
 0x7ca   :  { %855 = vsyncpa [#allocation9], 1 }
 0x7cb   :  { %856 = vsyncpa [#allocation4], 1 }

</bundles_post_ra>
